<compile_context>
chip_gen: v6e
topology: v6e:2x2x1
jax: 0.10.0
libtpu: 0.0.40
codegen_flags: <defaults>
</compile_context>

<pallas_src>
import jax
import jax.numpy as jnp
from jax.experimental import pallas as pl
from jax.experimental.pallas import tpu as pltpu

# `min_value` / `max_value` are free globals in the reference script; pick
# deterministic constants here.
# TODO(synk): confirm MIN_VALUE / MAX_VALUE against the actual model constants.
MIN_VALUE = 0.0
MAX_VALUE = 0.5


def _convt1x1_clamp_kernel(x_ref, w_ref, b_ref, o_ref):
    # x_ref: (Cin, TM), w_ref: (Cout, Cin), b_ref: (Cout, 1), o_ref: (Cout, TM)
    acc = jnp.dot(w_ref[...], x_ref[...], preferred_element_type=jnp.float32)
    acc = acc + b_ref[...]                    # broadcast bias over the lane dim
    acc = jnp.maximum(acc, MIN_VALUE)         # clamp_min
    acc = jnp.minimum(acc, MAX_VALUE)         # clamp_max
    o_ref[...] = acc.astype(o_ref.dtype)


def conv_transpose_1x1_clamp(x_nchw, weight, bias, *, tm_max=1024):
    """x_nchw: (N, Cin, H, W); weight: (Cin, Cout, 1, 1); bias: (Cout,)."""
    N, Cin, H, W = x_nchw.shape
    Cout = weight.shape[1]
    assert H > 2 and W > 2, "padding=1 on a 1x1 transposed conv requires H, W > 2"
    Hout, Wout = H - 2, W - 2
    M = Hout * Wout

    # Border crop (effect of padding=1). This strided slice is the only extra
    # XLA op around the kernel; the reshape below is a free view (no transpose).
    x_crop = x_nchw[:, :, 1:H - 1, 1:W - 1]           # (N, Cin, Hout, Wout)
    x_flat = x_crop.reshape(N, Cin, M)                # (N, Cin, M)

    # Tiny trace-time parameter reshapes (5x33 elements).
    w2d = jnp.transpose(weight.reshape(Cin, Cout))    # (Cout, Cin)
    b2d = bias.reshape(Cout, 1)                       # (Cout, 1)

    # Tile the lane (M) axis: full array if small, otherwise a multiple of 128
    # so the block shape is legal and the last (partial) block is masked.
    if M <= tm_max:
        TM = M
    else:
        TM = tm_max
    grid_m = pl.cdiv(M, TM)

    out_flat = pl.pallas_call(
        _convt1x1_clamp_kernel,
        out_shape=jax.ShapeDtypeStruct((N, Cout, M), x_nchw.dtype),
        grid_spec=pltpu.PrefetchScalarGridSpec(
            num_scalar_prefetch=0,
            grid=(N, grid_m),
            in_specs=[
                pl.BlockSpec((None, Cin, TM), lambda n, m: (n, 0, m)),
                pl.BlockSpec((Cout, Cin), lambda n, m: (0, 0)),
                pl.BlockSpec((Cout, 1), lambda n, m: (0, 0)),
            ],
            out_specs=pl.BlockSpec((None, Cout, TM), lambda n, m: (n, 0, m)),
        ),
        compiler_params=pltpu.CompilerParams(
            dimension_semantics=("parallel", "parallel")),
    )(x_flat, w2d, b2d)

    # (N, Cout, M) -> (N, Cout, Hout, Wout): a free reshape, no transpose.
    return out_flat.reshape(N, Cout, Hout, Wout)


def reference(x_nchw, weight, bias):
    """Pure-JAX reference of the same forward pass (for a sanity check)."""
    N, Cin, H, W = x_nchw.shape
    Cout = weight.shape[1]
    x_crop = x_nchw[:, :, 1:H - 1, 1:W - 1]
    v1 = jnp.einsum("nchw,co->nohw", x_crop, weight.reshape(Cin, Cout))
    v1 = v1 + bias.reshape(1, Cout, 1, 1)
    return jnp.clip(v1, MIN_VALUE, MAX_VALUE)


if __name__ == "__main__":
    key = jax.random.PRNGKey(0)
    kx, kw, kb = jax.random.split(key, 3)

    # Small shapes consistent with the module: Cin=5, Cout=33, spatial=16.
    N, Cin, H, W = 2, 5, 16, 16
    Cout = 33

    x = jax.random.normal(kx, (N, Cin, H, W), dtype=jnp.float32)
    # Deterministic parameter init (PyTorch ConvTranspose2d weight shape:
    # (in_channels, out_channels, 1, 1) = (Cin, Cout, 1, 1)).
    weight = 0.1 * jax.random.normal(kw, (Cin, Cout, 1, 1), dtype=jnp.float32)
    bias = 0.05 * jax.random.normal(kb, (Cout,), dtype=jnp.float32)

    out = conv_transpose_1x1_clamp(x, weight, bias)
    out = jax.block_until_ready(out)

    ref = reference(x, weight, bias)
    assert out.shape == (N, Cout, H - 2, W - 2), out.shape
    assert jnp.allclose(out, ref, atol=1e-5, rtol=1e-5), "mismatch vs reference"

    print("KERNEL_OK")
</pallas_src>

<mosaic_0001>
module attributes {stable_mosaic.version = 11 : i64} {
  func.func @_convt1x1_clamp_kernel(%arg0: i32, %arg1: i32, %arg2: memref<1x5x196xf32, #tpu.memory_space<vmem>>, %arg3: memref<33x5xf32, #tpu.memory_space<vmem>>, %arg4: memref<33x1xf32, #tpu.memory_space<vmem>>, %arg5: memref<1x33x196xf32, #tpu.memory_space<vmem>>) attributes {dimension_semantics = [#tpu.dimension_semantics<parallel>, #tpu.dimension_semantics<parallel>], iteration_bounds = array<i64: 2, 1>, scalar_prefetch = 0 : i64, scratch_operands = 0 : i64, tpu.core_type = #tpu.core_type<tc>, window_params = [{transform_indices = @transform_0, window_bounds = array<i64: 1, 5, 196>}, {pipeline_mode = #tpu.pipeline_mode<synchronous>, transform_indices = @transform_1, window_bounds = array<i64: 33, 5>}, {pipeline_mode = #tpu.pipeline_mode<synchronous>, transform_indices = @transform_2, window_bounds = array<i64: 33, 1>}, {transform_indices = @transform_3, window_bounds = array<i64: 1, 33, 196>}]} {
    %c0 = arith.constant 0 : index
    %c0_0 = arith.constant 0 : index
    %0 = vector.load %arg3[%c0, %c0_0] : memref<33x5xf32, #tpu.memory_space<vmem>>, vector<33x5xf32>
    %c0_1 = arith.constant 0 : index
    %c0_2 = arith.constant 0 : index
    %c0_3 = arith.constant 0 : index
    %1 = vector.load %arg2[%c0_1, %c0_2, %c0_3] : memref<1x5x196xf32, #tpu.memory_space<vmem>>, vector<1x5x196xf32>
    %2 = vector.shape_cast %1 : vector<1x5x196xf32> to vector<5x196xf32>
    %cst = arith.constant dense<0.000000e+00> : vector<33x196xf32>
    %3 = tpu.matmul %0, %2, %cst {dimension_numbers = #tpu.dot_dimension_numbers<[1], [0], [0], [1], [0, 0, 1, 1], [], []>} : vector<33x5xf32>, vector<5x196xf32>, vector<33x196xf32> -> vector<33x196xf32>
    %c0_4 = arith.constant 0 : index
    %c0_5 = arith.constant 0 : index
    %4 = vector.load %arg4[%c0_4, %c0_5] : memref<33x1xf32, #tpu.memory_space<vmem>>, vector<33x1xf32>
    %5 = vector.broadcast %4 : vector<33x1xf32> to vector<33x196xf32>
    %6 = arith.addf %3, %5 : vector<33x196xf32>
    %cst_6 = arith.constant 0.000000e+00 : f32
    %7 = vector.broadcast %cst_6 : f32 to vector<33x196xf32>
    %8 = arith.maximumf %6, %7 : vector<33x196xf32>
    %cst_7 = arith.constant 5.000000e-01 : f32
    %9 = vector.broadcast %cst_7 : f32 to vector<33x196xf32>
    %10 = arith.minimumf %8, %9 : vector<33x196xf32>
    %c0_8 = arith.constant 0 : index
    %c0_9 = arith.constant 0 : index
    %c0_10 = arith.constant 0 : index
    %11 = vector.load %arg5[%c0_8, %c0_9, %c0_10] : memref<1x33x196xf32, #tpu.memory_space<vmem>>, vector<1x33x196xf32>
    %12 = vector.shape_cast %11 : vector<1x33x196xf32> to vector<33x196xf32>
    %13 = vector.shape_cast %10 : vector<33x196xf32> to vector<1x33x196xf32>
    tpu.vector_store %arg5[%c0_8, %c0_9, %c0_10], %13 {strides = array<i32>} : memref<1x33x196xf32, #tpu.memory_space<vmem>>, vector<1x33x196xf32>,
    return
  }
  func.func @transform_0(%arg0: i32, %arg1: i32) -> (i32, i32, i32) {
    %c0_i32 = arith.constant 0 : i32
    %c0_i32_0 = arith.constant 0 : i32
    return %arg0, %c0_i32, %arg1 : i32, i32, i32
  }
  func.func @transform_1(%arg0: i32, %arg1: i32) -> (i32, i32) {
    %c0_i32 = arith.constant 0 : i32
    %c0_i32_0 = arith.constant 0 : i32
    %c0_i32_1 = arith.constant 0 : i32
    return %c0_i32, %c0_i32_0 : i32, i32
  }
  func.func @transform_2(%arg0: i32, %arg1: i32) -> (i32, i32) {
    %c0_i32 = arith.constant 0 : i32
    %c0_i32_0 = arith.constant 0 : i32
    %c0_i32_1 = arith.constant 0 : i32
    return %c0_i32, %c0_i32_0 : i32, i32
  }
  func.func @transform_3(%arg0: i32, %arg1: i32) -> (i32, i32, i32) {
    %c0_i32 = arith.constant 0 : i32
    %c0_i32_0 = arith.constant 0 : i32
    return %arg0, %c0_i32, %arg1 : i32, i32, i32
  }
}

</mosaic_0001>

<bundles_post_ra>
// kernel: tpu_custom_call.1
= control target key start
LH: loop header
LB: loop body
LE: loop exit
PB: predicated region body
PF: predicated region fallthrough
CT: control target
= control target key end

     0   :  { %s579_s12 = smov 0   ;;  %s581_s13 = smov 0   ;;  %s667_s0 = inlined_call_operand.vmem [shape: f32[2,5,196], index: 0, kind: input, shape index: {}]   ;;  %s668_s1 = inlined_call_operand.vmem [shape: f32[33,5], index: 1, kind: input, shape index: {}]   ;;  %s669_s2 = inlined_call_operand.vmem [shape: f32[33,1], index: 2, kind: input, shape index: {}]   ;;  %s670_s3 = inlined_call_operand.vmem [shape: f32[2,33,196], index: 3, kind: output, shape index: {}]  }
   0x1   :  { %s583_s14 = smov 0  }
   0x2 LB: > { %s25_s15 = sadd.s32 1, %s551_s13  ;;  %p488_p0 = scmp.ge.s32.totalorder %s555_s14, 1  ;;  %s555_s14 = sphi %s583_s14, %s13_s14   ;;  %s551_s13 = sphi %s581_s13, %s672_s13   ;;  %s547_s12 = sphi %s579_s12, %s671_s12  }
   0x3   : > { %p27_p1 = scmp.ge.s32.totalorder %s25_s15, 2  ;;  %p158_p2 = scmp.lt.s32.totalorder %s555_s14, 3 }
   0x5   : > { %s674_s15 = smov (%p27_p1, %s25_s15), 0  ;;  %p159_p3 = pnand %p488_p0, %p158_p2 }
   0x6   : > { %p191_p4 = scmp.lt.s32.totalorder (!%p159_p3), %s547_s12, 1 }
   0x7   : > { %162 = sbr.rel (%p159_p3) target bundleno = 228 (0xe4), region = 32 }
   0xc   : > { %v557_v0 = vmov 0.0   ;;  %s676_s12 = smov (!%p191_p4, %s547_s12), 1  ;;  %v558_v1 = vmov 0   ;;  %v217_v2 = vld [vmem:[%s669_s2] sm:$0xff]  ;;  %v219_v3 = vld [vmem:[%s669_s2 + $0x10] sm:$0xff]  ;;  %vm263_vm0 = vcmask 1044480  }
   0xd   : > { %334 = vmatprep.mubr.f32.mxu0 %v557_v0  ;;  %352 = vmatprep.mubr.f32.mxu1 %v557_v0  ;;  %s501_s20 = sshll.u32 %s676_s12, 4  ;;  %v210_v4 = vld [vmem:[%s668_s1] sm:$0xff]  ;;  %vm247_vm1 = vcmask 39936   ;;  %v213_v7 = vld [vmem:[%s668_s1 + $0x18] sm:$0xff]  ;;  %v218_v8 = vld [vmem:[%s669_s2 + $0x8] sm:$0xff]  ;;  %s504_s17 = smul.u32 80, %s676_s12 }
   0xe   : > { %531 = vset.pattern.permute.xlu0 %v558_v1  ;;  %532 = vset.pattern.permute.xlu1 %v558_v1  ;;  %s198_s23 = scalar_lea.vmem %s667_s0, %s501_s20  ;;  %v220_v9 = vld [vmem:[%s669_s2 + $0x18] sm:$0xff]  ;;  %v211_v10 = vld [vmem:[%s668_s1 + $0x8] sm:$0xff]  ;;  %v214_v11 = vld [vmem:[%s668_s1 + $0x20] sm:$0x1]  ;;  %vm386_vm2 = vcmask 556032   ;;  %vm395_vm3 = vcmask 548864  }
   0xf   : > { %224 = vperm.xlu0 %531, %v217_v2   ;;  %234 = vperm.xlu1 %532, %v219_v3   ;;  %v216_v5 = vld [vmem:[%s198_s23 + $0x8] sm:$0x1f]  ;;  %v215_v6 = vld [vmem:[%s198_s23] sm:$0x1f]  ;;  %v212_v13 = vld [vmem:[%s668_s1 + $0x10] sm:$0xff]  ;;  %s642_s20 = scalar_lea.vmem %s670_s3, %s504_s17 }
  0x10   : > { %492 = vmatprep.subr.msk.mxu0 %vm263_vm0, %v216_v5  ;;  %502 = vmatprep.subr.msk.mxu1 %vm263_vm0, %v216_v5  ;;  %v221_v12 = vld [vmem:[%s669_s2 + $0x20] sm:$0x1] }
  0x11   : > { %493 = vmatpush1.msk.msra.mxu0 %vm263_vm0, %v215_v6  ;;  %503 = vmatpush1.msk.msra.mxu1 %vm263_vm0, %v215_v6 }
  0x12   : > { %494 = vmatmul.mubr.msk.f32.vlgmr.msra.gmra.mxu0 %vm247_vm1, %v210_v4  ;;  %497 = vmatmul.mubr.msk.f32.vlgmr.msra.gmra.mxu1 %vm247_vm1, %v213_v7 }
  0x13   : > { %340 = vmatprep.mubr.f32.mxu0 %v557_v0  ;;  %358 = vmatprep.mubr.f32.mxu1 %v557_v0 }
  0x14   : > { %229 = vperm.xlu0 %531, %v218_v8   ;;  %239 = vperm.xlu1 %532, %v220_v9  }
  0x16   : > { %495 = vmatmul.mubr.msk.f32.gmra.mxu0 %vm247_vm1, %v211_v10  ;;  %498 = vmatmul.mubr.msk.f32.gmra.mxu1 %vm247_vm1, %v214_v11 }
  0x17   : > { %346 = vmatprep.mubr.f32.mxu0 %v557_v0 }
  0x18   : > { %244 = vperm.xlu0 %531, %v221_v12  }
  0x1a   : > { %496 = vmatmul.mubr.msk.f32.gmra.mxu0 %vm247_vm1, %v212_v13 }
  0x8a   : > { %v235_v14 = vpop.permute.xlu1 %234  ;;  %v225_v15 = vpop.permute.xlu0 %224 }
  0x8f   : > { %v240_v16 = vpop.permute.xlu1 %239  ;;  %v230_v17 = vpop.permute.xlu0 %229 }
  0x93   : > { %v245_v31 = vpop.permute.xlu0 %244 }
  0xd2   : > { %v336_v18 = vpop.f32.mrf.mxu0  ;;  %v354_v19 = vpop.f32.mrf.mxu1 }
  0xd3   : > { %v337_v20 = vadd.f32 %v336_v18, %v225_v15  ;;  %v355_v21 = vadd.f32 %v354_v19, %v240_v16 }
  0xd4   : > { %v338_v22 = vpop.f32.mrf.mxu0  ;;  %v356_v23 = vpop.f32.mrf.mxu1 }
  0xd5   : > { %v365_v24 = vmax.f32 %v337_v20, 0.0  ;;  %v339_v25 = vadd.f32 %v338_v22, %v225_v15  ;;  %v357_v26 = vadd.f32 %v356_v23, %v240_v16  ;;  %v371_v27 = vmax.f32 %v355_v21, 0.0 }
  0xd6   : > { %v342_v28 = vpop.f32.mrf.mxu0  ;;  %v360_v29 = vpop.f32.mrf.mxu1 }
  0xd7   : > { %v375_v30 = vmin.f32 %v365_v24, 0.5  ;;  %v366_v32 = vmax.f32 %v339_v25, 0.0  ;;  %v372_v33 = vmax.f32 %v357_v26, 0.0  ;;  %v381_v34 = vmin.f32 %v371_v27, 0.5 }
  0xd8   : > { %v343_v35 = vadd.f32 %v342_v28, %v230_v17  ;;  %v361_v36 = vadd.f32 %v360_v29, %v245_v31  ;;  %v344_v37 = vpop.f32.mrf.mxu0  ;;  %v362_v38 = vpop.f32.mrf.mxu1 }
  0xd9   : > { %385 = vst [vmem:[%s642_s20] sm:$0xff] %v375_v30  ;;  %v376_v39 = vmin.f32 %v366_v32, 0.5  ;;  %v382_v40 = vmin.f32 %v372_v33, 0.5  ;;  %392 = vst [vmem:[%s642_s20 + $0x30] sm:$0xff] %v381_v34  ;;  %v345_v41 = vadd.f32 %v344_v37, %v230_v17  ;;  %v363_v42 = vadd.f32 %v362_v38, %v245_v31 }
  0xda   : > { %v367_v43 = vmax.f32 %v343_v35, 0.0  ;;  %v373_v44 = vmax.f32 %v361_v36, 0.0  ;;  %v348_v45 = vpop.f32.mrf.mxu0 }
  0xdb   : > { %387 = vst.msk [vmem:[%s642_s20 + $0x8] sm:$0xff] %vm386_vm2, %v376_v39  ;;  %393 = vst.msk [vmem:[%s642_s20 + $0x38] sm:$0xff] %vm386_vm2, %v382_v40  ;;  %v368_v46 = vmax.f32 %v345_v41, 0.0  ;;  %v374_v47 = vmax.f32 %v363_v42, 0.0  ;;  %v349_v48 = vadd.f32 %v348_v45, %v235_v14 }
  0xdc   : > { %v377_v49 = vmin.f32 %v367_v43, 0.5  ;;  %v383_v50 = vmin.f32 %v373_v44, 0.5  ;;  %v350_v51 = vpop.f32.mrf.mxu0 }
  0xdd   : > { %v378_v52 = vmin.f32 %v368_v46, 0.5  ;;  %v384_v53 = vmin.f32 %v374_v47, 0.5  ;;  %v369_v54 = vmax.f32 %v349_v48, 0.0  ;;  %v351_v55 = vadd.f32 %v350_v51, %v235_v14 }
  0xde   : > { %388 = vst [vmem:[%s642_s20 + $0x10] sm:$0xff] %v377_v49  ;;  %394 = vst [vmem:[%s642_s20 + $0x40] sm:$0x1] %v383_v50 }
  0xdf   : > { %389 = vst.msk [vmem:[%s642_s20 + $0x18] sm:$0xff] %vm386_vm2, %v378_v52  ;;  %v379_v56 = vmin.f32 %v369_v54, 0.5  ;;  %v370_v57 = vmax.f32 %v351_v55, 0.0 }
  0xe0   : > { %396 = vst.msk [vmem:[%s642_s20 + $0x48] sm:$0x1] %vm395_vm3, %v384_v53 }
  0xe1   : > { %390 = vst [vmem:[%s642_s20 + $0x20] sm:$0xff] %v379_v56  ;;  %v380_v58 = vmin.f32 %v370_v57, 0.5 }
  0xe3   : > { %391 = vst.msk [vmem:[%s642_s20 + $0x28] sm:$0xff] %vm386_vm2, %v380_v58 }
  0xe4 PF: > { %s13_s14 = sadd.s32 1, %s555_s14   ;;  %s671_s12 = smov %s551_s13 }
  0xe5   : > { %p10_p5 = scmp.ge.s32.totalorder %s13_s14, 4   ;;  %s672_s13 = smov %s674_s15 }
  0xe7   :  { %12 = sbr.rel (!%p10_p5) target bundleno = 2 (0x2), region = 62 }

</bundles_post_ra>
